<compile_context>
chip_gen: v6e
topology: v6e:2x2x1
jax: 0.10.0
libtpu: 0.0.40
codegen_flags: <defaults>
</compile_context>

<pallas_src>
import jax
import jax.numpy as jnp
from jax.experimental import pallas as pl
from jax.experimental.pallas import tpu as pltpu

S_SCALE = 64.0
MARGIN = 0.4
_NEG_FILL = -1.0e4   # padded class columns: exp(s*fill - m) underflows to exactly 0


def margin_softmax_kernel(label_ref, tcos_ref, cos_ref, loss_ref, m_sc, l_sc):
    """Grid: (row_tiles, class_tiles); class axis is the innermost streaming reduction.

    Hot loop per element: upcast, *s, -m_new, exp (EUP), max/sum (XLU). The margin and
    the target-logit term are handled once per row in the finalize block.
    """
    k = pl.program_id(1)

    @pl.when(k == 0)
    def _init():
        m_sc[...] = jnp.full_like(m_sc, -jnp.inf)
        l_sc[...] = jnp.zeros_like(l_sc)

    logits = cos_ref[...].astype(jnp.float32) * S_SCALE     # plain scaled logits
    m_prev = m_sc[...]
    m_new = jnp.maximum(m_prev, jnp.max(logits, axis=-1, keepdims=True))
    alpha = jnp.exp(m_prev - m_new)            # == 0 on the first tile (m_prev = -inf)
    p = jnp.exp(logits - m_new)
    l_sc[...] = alpha * l_sc[...] + jnp.sum(p, axis=-1, keepdims=True)
    m_sc[...] = m_new

    @pl.when(k == pl.num_programs(1) - 1)
    def _finalize():
        valid = label_ref[...] != -1                  # (tile_n, 1); padded rows carry -1
        tcos = tcos_ref[...]                          # (tile_n, 1) f32 target cosine
        m = m_sc[...]
        t_plain = tcos * S_SCALE                      # target logit without margin
        t_marg = (tcos - MARGIN) * S_SCALE            # true margin-subtracted target logit
        e_marg = jnp.exp(t_marg - m)
        # swap the plain target term inside the LSE sum for the margin-subtracted one
        l_true = l_sc[...] - jnp.exp(t_plain - m) + e_marg
        # exact mathematical lower bound; guards the rare cancellation case
        l_true = jnp.maximum(l_true, e_marg)
        loss = m + jnp.log(l_true) - t_marg
        loss_ref[...] = jnp.where(valid, loss, 0.0)


def _vmem_limit_bytes():
    """Scoped-VMEM limit with headroom: ~48 MiB on v7x (64 MiB phys), ~96 MiB on v5e/v6e."""
    try:
        phys = int(pltpu.get_tpu_info().vmem_capacity_bytes)
    except Exception:
        phys = 64 * 1024 * 1024
    return int(min(phys * 3 // 4, 96 * 1024 * 1024))


def _pick_tile_n(n_pad):
    """Keep row tiles modest (<=256 rows) and make >=2 row tiles whenever possible
    so the 'parallel' row axis can span both v7x TensorCores."""
    for t in (256, 128, 64, 32, 16, 8):
        if n_pad % t == 0 and n_pad // t >= 2:
            return t
    return n_pad


def _pick_tile_c(c, tile_n, itemsize, block_budget_bytes, max_tile_c):
    """Class tile: as wide as the VMEM block budget allows (lane-multiple), with the
    class axis padded only up to the next tile multiple (small padding overhead)."""
    cols_budget = block_budget_bytes // max(tile_n * itemsize, 1)
    cols_budget = max(128, (cols_budget // 128) * 128)
    cols_budget = min(cols_budget, max_tile_c)
    num_tiles = -(-c // cols_budget)                  # ceil
    tile_c = 128 * (-(-c // (128 * num_tiles)))       # ceil to a lane multiple
    c_pad = num_tiles * tile_c
    return tile_c, c_pad


def margin_softmax_loss(cosine, label, *, tile_n=None, max_tile_c=8192):
    """cosine: (N, C) float32/bfloat16, label: (N,) int (-1 = ignore). Returns scalar loss.

    bf16 cosine is supported directly (the kernel upcasts per tile); do not cast here —
    a standalone wrapper-side cast would add a full extra HBM read+write pass.
    """
    n, c = cosine.shape
    label = label.astype(jnp.int32)
    valid = label != -1
    valid_cnt = jnp.sum(valid.astype(jnp.float32))

    # Target cosine per row, gathered once (thin (N, 1) stream into the kernel).
    safe_label = jnp.where(valid, label, 0)
    tcos = jnp.take_along_axis(cosine, safe_label[:, None], axis=1).astype(jnp.float32)

    # Row padding to a sublane multiple; padded rows get label = -1 (masked in-kernel).
    n_pad = ((n + 7) // 8) * 8
    if n_pad != n:
        cosine = jnp.pad(cosine, ((0, n_pad - n), (0, 0)))
        label = jnp.pad(label, (0, n_pad - n), constant_values=-1)
        tcos = jnp.pad(tcos, ((0, n_pad - n), (0, 0)))

    if tile_n is None:
        tile_n = _pick_tile_n(n_pad)
    assert n_pad % tile_n == 0 and tile_n % 8 == 0

    vmem_limit = _vmem_limit_bytes()
    block_budget = vmem_limit // 5          # room for double-buffered cosine + scratch
    itemsize = cosine.dtype.itemsize
    tile_c, c_pad = _pick_tile_c(c, tile_n, itemsize, block_budget, max_tile_c)
    if c_pad != c:
        # Fill MUST be very negative (not zero): padded columns must not enter the LSE.
        cosine = jnp.pad(cosine, ((0, 0), (0, c_pad - c)), constant_values=_NEG_FILL)
    assert c_pad % tile_c == 0

    grid = (n_pad // tile_n, c_pad // tile_c)
    label2d = label.reshape(n_pad, 1)

    per_row_loss = pl.pallas_call(
        margin_softmax_kernel,
        out_shape=jax.ShapeDtypeStruct((n_pad, 1), jnp.float32),
        grid_spec=pltpu.PrefetchScalarGridSpec(
            num_scalar_prefetch=0,
            grid=grid,
            in_specs=[
                pl.BlockSpec((tile_n, 1), lambda i, k: (i, 0)),        # labels (validity)
                pl.BlockSpec((tile_n, 1), lambda i, k: (i, 0)),        # target cosine
                pl.BlockSpec((tile_n, tile_c), lambda i, k: (i, k)),   # cosine tile
            ],
            out_specs=pl.BlockSpec((tile_n, 1), lambda i, k: (i, 0)),
            scratch_shapes=[
                pltpu.VMEM((tile_n, 1), jnp.float32),   # running max  m_i
                pltpu.VMEM((tile_n, 1), jnp.float32),   # running exp-sum l_i
            ],
        ),
        compiler_params=pltpu.CompilerParams(
            dimension_semantics=("parallel", "arbitrary"),
            vmem_limit_bytes=vmem_limit,
        ),
        cost_estimate=pl.CostEstimate(
            flops=4 * n_pad * c_pad,
            transcendentals=n_pad * c_pad,
            bytes_accessed=n_pad * c_pad * itemsize + 16 * n_pad,
        ),
    )(label2d, tcos, cosine)

    return jnp.sum(per_row_loss) / jnp.maximum(valid_cnt, 1.0)


def margin_softmax_loss_ref(cosine, label):
    """Pure-JAX reference mirroring the PyTorch forward + CE(ignore_index=-1)."""
    n, c = cosine.shape
    valid = label != -1
    safe_label = jnp.where(valid, label, 0)
    one_hot = jax.nn.one_hot(safe_label, c, dtype=jnp.float32) * valid[:, None]
    logits = (cosine.astype(jnp.float32) - MARGIN * one_hot) * S_SCALE
    logp = jax.nn.log_softmax(logits, axis=-1)
    nll = -jnp.take_along_axis(logp, safe_label[:, None], axis=1)[:, 0]
    nll = jnp.where(valid, nll, 0.0)
    return jnp.sum(nll) / jnp.maximum(jnp.sum(valid.astype(jnp.float32)), 1.0)


if __name__ == "__main__":
    key = jax.random.PRNGKey(0)
    k1, k2, k3, k4, k5, k6 = jax.random.split(key, 6)

    # Case 1: 2 row tiles x 2 class tiles — exercises the streaming LSE accumulation,
    # the finalize margin fix-up, and a multi-tile parallel row axis.
    N1, C1 = 16, 256
    cos1 = jnp.tanh(jax.random.normal(k1, (N1, C1), dtype=jnp.float32))
    lab1 = jax.random.randint(k2, (N1,), 0, C1, dtype=jnp.int32)
    lab1 = lab1.at[3].set(-1)   # one ignored row
    out1 = jax.block_until_ready(margin_softmax_loss(cos1, lab1, max_tile_c=128))
    ref1 = margin_softmax_loss_ref(cos1, lab1)
    assert jnp.allclose(out1, ref1, rtol=1e-4, atol=1e-5), (out1, ref1)

    # Case 2: auto tiles + row padding (N not a multiple of 8) + class padding
    # (C not a multiple of 128 -> padded with the large-negative fill).
    N2, C2 = 6, 200
    cos2 = jnp.tanh(jax.random.normal(k3, (N2, C2), dtype=jnp.float32))
    lab2 = jax.random.randint(k4, (N2,), 0, C2, dtype=jnp.int32)
    lab2 = lab2.at[0].set(-1)
    out2 = jax.block_until_ready(margin_softmax_loss(cos2, lab2))
    ref2 = margin_softmax_loss_ref(cos2, lab2)
    assert jnp.allclose(out2, ref2, rtol=1e-4, atol=1e-5), (out2, ref2)

    # Case 3: bf16 cosine fed straight to the kernel (halves HBM bytes; kernel upcasts).
    N3, C3 = 16, 384
    cos3 = jnp.tanh(jax.random.normal(k5, (N3, C3), dtype=jnp.float32)).astype(jnp.bfloat16)
    lab3 = jax.random.randint(k6, (N3,), 0, C3, dtype=jnp.int32)
    out3 = jax.block_until_ready(margin_softmax_loss(cos3, lab3, max_tile_c=128))
    ref3 = margin_softmax_loss_ref(cos3, lab3)
    assert jnp.allclose(out3, ref3, rtol=1e-3, atol=1e-3), (out3, ref3)

    print("KERNEL_OK")
</pallas_src>

<mosaic_0001>
module attributes {stable_mosaic.version = 11 : i64} {
  func.func @margin_softmax_kernel(%arg0: i32, %arg1: i32, %arg2: memref<8x1xi32, #tpu.memory_space<vmem>>, %arg3: memref<8x1xf32, #tpu.memory_space<vmem>>, %arg4: memref<8x128xf32, #tpu.memory_space<vmem>>, %arg5: memref<8x1xf32, #tpu.memory_space<vmem>>, %arg6: memref<8x1xf32, #tpu.memory_space<vmem>>, %arg7: memref<8x1xf32, #tpu.memory_space<vmem>>) attributes {dimension_semantics = [#tpu.dimension_semantics<parallel>, #tpu.dimension_semantics<arbitrary>], iteration_bounds = array<i64: 2, 2>, scalar_prefetch = 0 : i64, scratch_operands = 2 : i64, tpu.core_type = #tpu.core_type<tc>, window_params = [{transform_indices = @transform_0, window_bounds = array<i64: 8, 1>}, {transform_indices = @transform_1, window_bounds = array<i64: 8, 1>}, {transform_indices = @transform_2, window_bounds = array<i64: 8, 128>}, {transform_indices = @transform_3, window_bounds = array<i64: 8, 1>}]} {
    %c0_i32 = arith.constant 0 : i32
    %0 = arith.cmpi eq, %arg1, %c0_i32 : i32
    %1 = arith.extui %0 : i1 to i32
    %c0_i32_0 = arith.constant 0 : i32
    %2 = arith.cmpi ne, %1, %c0_i32_0 : i32
    scf.if %2 {
      %cst_13 = arith.constant 0xFF800000 : f32
      %25 = vector.broadcast %cst_13 : f32 to vector<8x1xf32>
      %c0_14 = arith.constant 0 : index
      %c0_15 = arith.constant 0 : index
      %26 = vector.load %arg6[%c0_14, %c0_15] : memref<8x1xf32, #tpu.memory_space<vmem>>, vector<8x1xf32>
      tpu.vector_store %arg6[%c0_14, %c0_15], %25 {strides = array<i32>} : memref<8x1xf32, #tpu.memory_space<vmem>>, vector<8x1xf32>,
      %cst_16 = arith.constant 0.000000e+00 : f32
      %27 = vector.broadcast %cst_16 : f32 to vector<8x1xf32>
      %c0_17 = arith.constant 0 : index
      %c0_18 = arith.constant 0 : index
      %28 = vector.load %arg7[%c0_17, %c0_18] : memref<8x1xf32, #tpu.memory_space<vmem>>, vector<8x1xf32>
      tpu.vector_store %arg7[%c0_17, %c0_18], %27 {strides = array<i32>} : memref<8x1xf32, #tpu.memory_space<vmem>>, vector<8x1xf32>,
    } else {
    }
    %c0 = arith.constant 0 : index
    %c0_1 = arith.constant 0 : index
    %3 = vector.load %arg4[%c0, %c0_1] : memref<8x128xf32, #tpu.memory_space<vmem>>, vector<8x128xf32>
    %cst = arith.constant 6.400000e+01 : f32
    %4 = vector.broadcast %cst : f32 to vector<8x128xf32>
    %5 = arith.mulf %3, %4 : vector<8x128xf32>
    %c0_2 = arith.constant 0 : index
    %c0_3 = arith.constant 0 : index
    %6 = vector.load %arg6[%c0_2, %c0_3] : memref<8x1xf32, #tpu.memory_space<vmem>>, vector<8x1xf32>
    %cst_4 = arith.constant dense<0xFF800000> : vector<8xf32>
    %7 = vector.multi_reduction <maximumf>, %5, %cst_4 [1] : vector<8x128xf32> to vector<8xf32>
    %8 = vector.shape_cast %7 : vector<8xf32> to vector<8x1xf32>
    %9 = arith.maximumf %6, %8 : vector<8x1xf32>
    %10 = arith.subf %6, %9 : vector<8x1xf32>
    %11 = math.exp %10 : vector<8x1xf32>
    %12 = vector.broadcast %9 : vector<8x1xf32> to vector<8x128xf32>
    %13 = arith.subf %5, %12 : vector<8x128xf32>
    %14 = math.exp %13 : vector<8x128xf32>
    %c0_5 = arith.constant 0 : index
    %c0_6 = arith.constant 0 : index
    %15 = vector.load %arg7[%c0_5, %c0_6] : memref<8x1xf32, #tpu.memory_space<vmem>>, vector<8x1xf32>
    %16 = arith.mulf %11, %15 : vector<8x1xf32>
    %cst_7 = arith.constant dense<0.000000e+00> : vector<8xf32>
    %17 = vector.multi_reduction <add>, %14, %cst_7 [1] : vector<8x128xf32> to vector<8xf32>
    %18 = vector.shape_cast %17 : vector<8xf32> to vector<8x1xf32>
    %19 = arith.addf %16, %18 : vector<8x1xf32>
    %c0_8 = arith.constant 0 : index
    %c0_9 = arith.constant 0 : index
    %20 = vector.load %arg7[%c0_8, %c0_9] : memref<8x1xf32, #tpu.memory_space<vmem>>, vector<8x1xf32>
    tpu.vector_store %arg7[%c0_8, %c0_9], %19 {strides = array<i32>} : memref<8x1xf32, #tpu.memory_space<vmem>>, vector<8x1xf32>,
    %c0_10 = arith.constant 0 : index
    %c0_11 = arith.constant 0 : index
    %21 = vector.load %arg6[%c0_10, %c0_11] : memref<8x1xf32, #tpu.memory_space<vmem>>, vector<8x1xf32>
    tpu.vector_store %arg6[%c0_10, %c0_11], %9 {strides = array<i32>} : memref<8x1xf32, #tpu.memory_space<vmem>>, vector<8x1xf32>,
    %c1_i32 = arith.constant 1 : i32
    %22 = arith.cmpi eq, %arg1, %c1_i32 : i32
    %23 = arith.extui %22 : i1 to i32
    %c0_i32_12 = arith.constant 0 : i32
    %24 = arith.cmpi ne, %23, %c0_i32_12 : i32
    scf.if %24 {
      %c0_13 = arith.constant 0 : index
      %c0_14 = arith.constant 0 : index
      %25 = vector.load %arg2[%c0_13, %c0_14] : memref<8x1xi32, #tpu.memory_space<vmem>>, vector<8x1xi32>
      %c-1_i32 = arith.constant -1 : i32
      %26 = vector.broadcast %c-1_i32 : i32 to vector<8x1xi32>
      %27 = arith.cmpi ne, %25, %26 : vector<8x1xi32>
      %c0_15 = arith.constant 0 : index
      %c0_16 = arith.constant 0 : index
      %28 = vector.load %arg3[%c0_15, %c0_16] : memref<8x1xf32, #tpu.memory_space<vmem>>, vector<8x1xf32>
      %c0_17 = arith.constant 0 : index
      %c0_18 = arith.constant 0 : index
      %29 = vector.load %arg6[%c0_17, %c0_18] : memref<8x1xf32, #tpu.memory_space<vmem>>, vector<8x1xf32>
      %cst_19 = arith.constant 6.400000e+01 : f32
      %30 = vector.broadcast %cst_19 : f32 to vector<8x1xf32>
      %31 = arith.mulf %28, %30 : vector<8x1xf32>
      %cst_20 = arith.constant 4.000000e-01 : f32
      %32 = vector.broadcast %cst_20 : f32 to vector<8x1xf32>
      %33 = arith.subf %28, %32 : vector<8x1xf32>
      %cst_21 = arith.constant 6.400000e+01 : f32
      %34 = vector.broadcast %cst_21 : f32 to vector<8x1xf32>
      %35 = arith.mulf %33, %34 : vector<8x1xf32>
      %36 = arith.subf %35, %29 : vector<8x1xf32>
      %37 = math.exp %36 : vector<8x1xf32>
      %c0_22 = arith.constant 0 : index
      %c0_23 = arith.constant 0 : index
      %38 = vector.load %arg7[%c0_22, %c0_23] : memref<8x1xf32, #tpu.memory_space<vmem>>, vector<8x1xf32>
      %39 = arith.subf %31, %29 : vector<8x1xf32>
      %40 = math.exp %39 : vector<8x1xf32>
      %41 = arith.subf %38, %40 : vector<8x1xf32>
      %42 = arith.addf %41, %37 : vector<8x1xf32>
      %43 = arith.maximumf %42, %37 : vector<8x1xf32>
      %44 = math.log %43 : vector<8x1xf32>
      %45 = arith.addf %29, %44 : vector<8x1xf32>
      %46 = arith.subf %45, %35 : vector<8x1xf32>
      %cst_24 = arith.constant 0.000000e+00 : f32
      %47 = vector.broadcast %cst_24 : f32 to vector<8x1xf32>
      %48 = arith.select %27, %46, %47 : vector<8x1xi1>, vector<8x1xf32>
      %c0_25 = arith.constant 0 : index
      %c0_26 = arith.constant 0 : index
      %49 = vector.load %arg5[%c0_25, %c0_26] : memref<8x1xf32, #tpu.memory_space<vmem>>, vector<8x1xf32>
      tpu.vector_store %arg5[%c0_25, %c0_26], %48 {strides = array<i32>} : memref<8x1xf32, #tpu.memory_space<vmem>>, vector<8x1xf32>,
    } else {
    }
    return
  }
  func.func @transform_0(%arg0: i32, %arg1: i32) -> (i32, i32) {
    %c0_i32 = arith.constant 0 : i32
    %c0_i32_0 = arith.constant 0 : i32
    return %arg0, %c0_i32 : i32, i32
  }
  func.func @transform_1(%arg0: i32, %arg1: i32) -> (i32, i32) {
    %c0_i32 = arith.constant 0 : i32
    %c0_i32_0 = arith.constant 0 : i32
    return %arg0, %c0_i32 : i32, i32
  }
  func.func @transform_2(%arg0: i32, %arg1: i32) -> (i32, i32) {
    %c0_i32 = arith.constant 0 : i32
    return %arg0, %arg1 : i32, i32
  }
  func.func @transform_3(%arg0: i32, %arg1: i32) -> (i32, i32) {
    %c0_i32 = arith.constant 0 : i32
    %c0_i32_0 = arith.constant 0 : i32
    return %arg0, %c0_i32 : i32, i32
  }
}

</mosaic_0001>

<bundles_post_ra>
// kernel: tpu_custom_call.1
= control target key start
LH: loop header
LB: loop body
LE: loop exit
PB: predicated region body
PF: predicated region fallthrough
CT: control target
= control target key end

     0   :  { %s511_s12 = smov 0   ;;  %s513_s13 = smov 0   ;;  %s597_s0 = inlined_call_operand.vmem [shape: s32[16,1], index: 0, kind: input, shape index: {}]   ;;  %s598_s1 = inlined_call_operand.vmem [shape: f32[16,1], index: 1, kind: input, shape index: {}]   ;;  %s599_s2 = inlined_call_operand.vmem [shape: f32[16,256], index: 2, kind: input, shape index: {}]   ;;  %s600_s3 = inlined_call_operand.vmem [shape: f32[16,1], index: 3, kind: output, shape index: {}]  }
   0x1   :  { %s515_s14 = smov 0   ;;  %s517_s15 = smov 0  }
   0x2   :  { %s519_s16 = smov 0  }
   0x3 LB: > { %s22_s17 = sadd.s32 1, %s478_s14  ;;  %s25_s18 = sadd.s32 1, %s482_s15  ;;  %s486_s16 = sphi %s519_s16, %s13_s16   ;;  %s482_s15 = sphi %s517_s15, %s604_s15   ;;  %s478_s14 = sphi %s515_s14, %s603_s14   ;;  %s474_s13 = sphi %s513_s13, %s602_s13   ;;  %s470_s12 = sphi %s511_s12, %s601_s12  }
   0x4   : > { %p23_p0 = scmp.ge.s32.totalorder %s22_s17, 2  ;;  %p383_p1 = scmp.ge.s32.totalorder %s486_s16, 1 }
   0x5   : > { %p172_p2 = scmp.lt.s32.totalorder %s486_s16, 5 }
   0x6   : > { %s606_s17 = smov (%p23_p0, %s22_s17), 0  ;;  %s608_s18 = smov (!%p23_p0, %s25_s18), %s482_s15 }
   0x7   : > { %p173_p3 = pnand %p383_p1, %p172_p2  ;;  %p27_p4 = scmp.ge.s32.totalorder %s608_s18, 2 }
   0x8   : > { %p206_p5 = scmp.lt.s32.totalorder (!%p173_p3), %s474_s13, 1  ;;  %p216_p6 = scmp.lt.s32.totalorder (!%p173_p3), %s470_s12, 1 }
   0x9   : > { %s610_s18 = smov (%p27_p4, %s608_s18), 0  ;;  %176 = sbr.rel (%p173_p3) target bundleno = 501 (0x1f5), region = 32 }
   0xa   : > { %p389_p7 = scmp.ne.s32.totalorder (!%p173_p3), %s470_s12, 0 }
   0xe   : > { %s612_s13 = smov (!%p206_p5, %s474_s13), 1 }
   0xf   : > { %s217_s19 = scalar_select %p216_p6, %s470_s12, 1 }
  0x10   : > { %s545_s20 = sshll.u32 %s612_s13, 3  ;;  %s386_s21 = sshll.u32 %s612_s13, 1 }
  0x11   : > { %s209_s24 = scalar_lea.vmem %s597_s0, %s545_s20  ;;  %s213_s27 = scalar_lea.vmem %s598_s1, %s545_s20 }
  0x12   : > { %s219_s28 = sadd.s32 %s386_s21, %s217_s19  ;;  %s225_s4 = scalar_lea.vmem %s600_s3, %s545_s20 }
  0x13   : > { %s387_s5 = sshll.u32 %s219_s28, 3  ;;  %229 = sbr.rel (%p389_p7) target bundleno = 26 (0x1a), region = 36 }
  0x14   : > { %s221_s8 = scalar_lea.vmem %s599_s2, %s387_s5 }
  0x18   : > { %vm230_vm0 = vcmask 7168   ;;  %v488_v0 = vmov -inf   ;;  %v489_v1 = vmov 0.0  }
  0x19   : > { %231 = vst.msk [vmem:[#allocation2] sm:$0xff] %vm230_vm0, %v488_v0  ;;  %232 = vst.msk [vmem:[#allocation3] sm:$0xff] %vm230_vm0, %v489_v1 }
  0x1a PF: > { %v233_v2 = vld [vmem:[%s221_s8] sm:$0xff]  ;;  %v490_v4 = vmov 0   ;;  %vm255_vm1 = vcmask 7168   ;;  %p390_p8 = scmp.ne.s32.totalorder %s470_s12, 1 }
  0x1b   : > { %v234_v3 = vmul.f32 64.0, %v233_v2  ;;  %437 = vset.pattern.permute.xlu0 %v490_v4 }
  0x1d   : > { %236 = vmax.xlane.f32.xlu0 %v234_v3 }
  0x20   : > { %v235_v5 = vld [vmem:[#allocation2] sm:$0xff]  ;;  %v250_v15 = vld [vmem:[#allocation3] sm:$0xff] }
  0xa6   : > { %v237_v6 = vpop.xlane.xlu0 %236 }
  0xa7   : > { %v238_v7 = vmax.f32 %v235_v5, %v237_v6 }
  0xa9   : > { %v239_v8 = vsub.f32 %v235_v5, %v238_v7  ;;  %257 = vst.msk [vmem:[#allocation2] sm:$0xff] %vm255_vm1, %v238_v7  ;;  %244 = vperm.xlu0 %437, %v238_v7  }
  0xab   : > { %v240_v13 = vmul.f32 1.442695, %v239_v8 }
 0x124   : > { %v245_v9 = vpop.permute.xlu0 %244 }
 0x125   : > { %v247_v10 = vsub.f32 %v234_v3, %v245_v9 }
 0x127   : > { %v248_v11 = vmul.f32 1.442695, %v247_v10 }
 0x129   : > { %438 = vpow2.f32 %v248_v11 }
 0x12a   : > { %440 = vpow2.f32 %v240_v13 }
 0x136   : > { %v439_v12 = vpop.eup %438 }
 0x137   : > { %252 = vadd.xlane.f32.xlu1 %v439_v12  ;;  %v441_v14 = vpop.eup %440 }
 0x138   : > { %v251_v16 = vmul.f32 %v441_v14, %v250_v15 }
 0x1bf   : > { %261 = sbr.rel (%p390_p8) target bundleno = 501 (0x1f5), region = 40 }
 0x1c0   : > { %v253_v17 = vpop.xlane.xlu1 %252 }
 0x1c1   : > { %v254_v18 = vadd.f32 %v253_v17, %v251_v16 }
 0x1c3   : > { %256 = vst.msk [vmem:[#allocation3] sm:$0xff] %vm255_vm1, %v254_v18 }
 0x1c4   : > { %v264_v19 = vld [vmem:[%s213_s27] sm:$0xff] }
 0x1c5   : > { %v265_v20 = vld [vmem:[#allocation2] sm:$0xff]  ;;  %v266_v21 = vmul.f32 64.0, %v264_v19  ;;  %v391_v22 = vadd.f32 -0.4, %v264_v19 }
 0x1c6   : > { %v262_v35 = vld [vmem:[%s209_s24] sm:$0xff] }
 0x1c7   : > { %v268_v23 = vmul.f32 64.0, %v391_v22  ;;  %v273_v24 = vsub.f32 %v266_v21, %v265_v20  ;;  %vm263_vm2 = vcmp.ne.s32.totalorder %v262_v35, 4294967295 }
 0x1c9   : > { %v269_v25 = vsub.f32 %v268_v23, %v265_v20  ;;  %v274_v26 = vmul.f32 1.442695, %v273_v24 }
 0x1ca   : > { %v272_v28 = vld [vmem:[#allocation3] sm:$0xff] }
 0x1cb   : > { %v270_v27 = vmul.f32 1.442695, %v269_v25  ;;  %442 = vpow2.f32 %v274_v26 }
 0x1cd   : > { %444 = vpow2.f32 %v270_v27 }
 0x1d8   : > { %v443_v29 = vpop.eup %442 }
 0x1d9   : > { %v276_v30 = vsub.f32 %v272_v28, %v443_v29 }
 0x1da   : > { %v445_v31 = vpop.eup %444 }
 0x1db   : > { %v277_v32 = vadd.f32 %v445_v31, %v276_v30 }
 0x1dd   : > { %v278_v33 = vmax.f32 %v277_v32, %v445_v31 }
 0x1df   : > { %446 = vlog2.f32 %v278_v33 }
 0x1ec   : > { %v447_v34 = vpop.eup %446 }
 0x1ed   : > { %v280_v36 = vmul.f32 0.6931472, %v447_v34 }
 0x1ef   : > { %v281_v37 = vadd.f32 %v280_v36, %v265_v20 }
 0x1f1   : > { %v282_v38 = vsub.f32 %v281_v37, %v268_v23 }
 0x1f3   : > { %v283_v39 = vsel %vm263_vm2, %v282_v38, 0.0 }
 0x1f4   : > { %284 = vst.msk [vmem:[%s225_s4] sm:$0xff] %vm255_vm1, %v283_v39 }
 0x1f5 PF: > { %s13_s16 = sadd.s32 1, %s486_s16   ;;  %s601_s12 = smov %s478_s14 }
 0x1f6   : > { %p10_p9 = scmp.ge.s32.totalorder %s13_s16, 6   ;;  %s602_s13 = smov %s482_s15 }
 0x1f7   : > { %s603_s14 = smov %s606_s17  ;;  %s604_s15 = smov %s610_s18 }
 0x1f8   :  { %12 = sbr.rel (!%p10_p9) target bundleno = 3 (0x3), region = 76 }

</bundles_post_ra>
